<compile_context>
chip_gen: v7x
topology: tpu7x:2x2x1
jax: 0.10.0
libtpu: 0.0.40
codegen_flags: <defaults>
</compile_context>

<pallas_src>
import jax
import jax.numpy as jnp
from jax.experimental import pallas as pl
from jax.experimental.pallas import tpu as pltpu

_MiB = 1024 * 1024
_LANE = 128


def _chomp_copy_kernel(x_ref, o_ref):
    l_out = o_ref.shape[-1]
    if x_ref.shape[-1] == l_out:
        # Hot path: input block already excludes the chomped tail.
        o_ref[...] = x_ref[...]
    else:
        # Tiny-L fallback: input block carries the full row length; static slice.
        o_ref[...] = x_ref[:, :l_out]


def _default_block_budget_bytes() -> int:
    """~2 MiB/block on v5e/v6e (>=90% of roofline), ~4 MiB on v7x (3.2 TB/s)."""
    try:
        info = pltpu.get_tpu_info()
        vmem = int(getattr(info, "vmem_capacity_bytes", 0) or 0)
        if 0 < vmem <= 64 * _MiB:   # v7x: 64 MiB VMEM/TC, much faster HBM
            return 4 * _MiB
    except Exception:
        pass
    return 2 * _MiB


def chomp1d(x: jax.Array, chomp_size: int, *,
            block_budget_bytes: int | None = None) -> jax.Array:
    """Equivalent of Chomp1d(chomp_size).forward(x) for x of shape (N, C, L)."""
    assert x.ndim == 3, "expected (N, C, L)"
    n, c, l = x.shape
    # Note: PyTorch's x[:, :, :-0] yields an *empty* tensor; standard TCN usage
    # always has chomp_size = (kernel-1)*dilation >= 1, which we require here.
    assert 0 < chomp_size < l, "chomp_size must be in (0, L)"
    l_out = l - chomp_size
    itemsize = jnp.dtype(x.dtype).itemsize
    sub = max(8, 32 // itemsize)           # sublane packing: f32->8, bf16->16, i8->32
    r = n * c

    if block_budget_bytes is None:
        block_budget_bytes = _default_block_budget_bytes()
    elems_budget = max(1, block_budget_bytes // itemsize)

    x2 = x.reshape(r, l)                   # free reshape for a contiguous input

    if l_out >= _LANE:
        # Lane-dense path: grow tl first (long contiguous DMA runs, unmasked
        # stores), then grow tr with whatever budget remains.
        max_tl = _LANE * (l_out // _LANE)
        tr_min = sub if r >= sub else r
        tl = min(max_tl, _LANE * max(1, elems_budget // (tr_min * _LANE)))
        if r >= sub:
            tr = min(sub * (r // sub), sub * max(1, (elems_budget // tl) // sub))
        else:
            tr = r                           # full (small) row dim — legal block shape
        tl_in = tl
        bytes_accessed = 2 * r * l_out * itemsize        # read + write, no tail
    else:
        # Tiny-L fallback: input block carries the full L; kernel slices.
        if r >= sub:
            tr = min(sub * (r // sub), sub * max(1, (elems_budget // l) // sub))
        else:
            tr = r
        tl = l_out                           # full output dim (legal block shape)
        tl_in = l                            # full input dim  (legal block shape)
        bytes_accessed = r * (l + l_out) * itemsize

    # v7x has 2 TensorCores sharing HBM bandwidth: avoid a degenerate
    # single-block grid for non-trivial problems by splitting the widest axis.
    if (pl.cdiv(r, tr) * pl.cdiv(l_out, tl) == 1
            and r * l_out * itemsize > 256 * 1024):
        if tl >= 2 * _LANE:
            tl = _LANE * pl.cdiv(tl // _LANE, 2)
            tl_in = tl
        elif tr >= 2 * sub:
            tr = sub * pl.cdiv(tr // sub, 2)

    grid = (pl.cdiv(r, tr), pl.cdiv(l_out, tl))

    # Double-buffered in + out footprint; explicit limit so bigger blocks are
    # safe on v5e's 16 MiB scoped default yet within v7x's 64 MiB physical VMEM.
    footprint = 2 * tr * (tl_in + tl) * itemsize
    vmem_limit = int(min(48 * _MiB, max(32 * _MiB, 2 * footprint)))

    out2 = pl.pallas_call(
        _chomp_copy_kernel,
        out_shape=jax.ShapeDtypeStruct((r, l_out), x.dtype),
        grid_spec=pltpu.PrefetchScalarGridSpec(
            num_scalar_prefetch=0,
            grid=grid,
            in_specs=[pl.BlockSpec((tr, tl_in), lambda ri, li: (ri, li))],
            out_specs=pl.BlockSpec((tr, tl), lambda ri, li: (ri, li)),
        ),
        compiler_params=pltpu.CompilerParams(
            dimension_semantics=("parallel", "parallel"),
            vmem_limit_bytes=vmem_limit,
        ),
        cost_estimate=pl.CostEstimate(
            flops=0, transcendentals=0, bytes_accessed=bytes_accessed),
    )(x2)
    return out2.reshape(n, c, l_out)


if __name__ == "__main__":
    key = jax.random.PRNGKey(0)

    # 1) Small shape consistent with the module: (N, C, L) = (2, 4, 16), chomp=3.
    #    Exercises the tiny-L fallback path (l_out < 128).
    N, C, L = 2, 4, 16
    chomp_size = 3
    x = jax.random.normal(key, (N, C, L), dtype=jnp.float32)
    out = jax.block_until_ready(chomp1d(x, chomp_size))
    ref = x[:, :, :-chomp_size]
    assert out.shape == (N, C, L - chomp_size), out.shape
    assert out.dtype == x.dtype
    assert jnp.array_equal(out, ref), "mismatch vs reference slice (small path)"

    # 2) Shape exercising the lane-dense tiled path with a masked edge L block
    #    (l_out % 128 != 0): (2, 16, 203), chomp=3 -> l_out=200.
    x2 = jax.random.normal(jax.random.PRNGKey(0), (2, 16, 203), dtype=jnp.float32)
    out2 = jax.block_until_ready(chomp1d(x2, 3))
    ref2 = x2[:, :, :-3]
    assert out2.shape == (2, 16, 200), out2.shape
    assert jnp.array_equal(out2, ref2), "mismatch vs reference slice (tiled path)"

    # 3) bf16 case exercising dtype-aware sublane rounding and small row count
    #    (N*C = 6 < 16): (2, 3, 300), chomp=44 -> l_out=256.
    x3 = jax.random.normal(jax.random.PRNGKey(0), (2, 3, 300)).astype(jnp.bfloat16)
    out3 = jax.block_until_ready(chomp1d(x3, 44))
    ref3 = x3[:, :, :-44]
    assert out3.shape == (2, 3, 256), out3.shape
    assert out3.dtype == jnp.bfloat16
    assert jnp.array_equal(out3, ref3), "mismatch vs reference slice (bf16 path)"

    print("KERNEL_OK")
</pallas_src>

<mosaic_0001>
module attributes {stable_mosaic.version = 11 : i64} {
  func.func @_chomp_copy_kernel(%arg0: i32, %arg1: i32, %arg2: memref<8x16xf32, #tpu.memory_space<vmem>>, %arg3: memref<8x13xf32, #tpu.memory_space<vmem>>) attributes {dimension_semantics = [#tpu.dimension_semantics<parallel>, #tpu.dimension_semantics<parallel>], iteration_bounds = array<i64: 1, 1>, scalar_prefetch = 0 : i64, scratch_operands = 0 : i64, tpu.core_type = #tpu.core_type<tc>, window_params = [{transform_indices = @transform_0, window_bounds = array<i64: 8, 16>}, {transform_indices = @transform_1, window_bounds = array<i64: 8, 13>}]} {
    %c0 = arith.constant 0 : index
    %c0_0 = arith.constant 0 : index
    %0 = vector.load %arg2[%c0, %c0_0] : memref<8x16xf32, #tpu.memory_space<vmem>>, vector<8x13xf32>
    %c0_1 = arith.constant 0 : index
    %c0_2 = arith.constant 0 : index
    %1 = vector.load %arg3[%c0_1, %c0_2] : memref<8x13xf32, #tpu.memory_space<vmem>>, vector<8x13xf32>
    tpu.vector_store %arg3[%c0_1, %c0_2], %0 {strides = array<i32>} : memref<8x13xf32, #tpu.memory_space<vmem>>, vector<8x13xf32>,
    return
  }
  func.func @transform_0(%arg0: i32, %arg1: i32) -> (i32, i32) {
    %c0_i32 = arith.constant 0 : i32
    return %arg0, %arg1 : i32, i32
  }
  func.func @transform_1(%arg0: i32, %arg1: i32) -> (i32, i32) {
    %c0_i32 = arith.constant 0 : i32
    return %arg0, %arg1 : i32, i32
  }
}

</mosaic_0001>

<bundles_post_ra>
// kernel: tpu_custom_call.1
= control target key start
LH: loop header
LB: loop body
LE: loop exit
PB: predicated region body
PF: predicated region fallthrough
CT: control target
= control target key end

     0   :  { %6 = vsyncpa [#allocation3], 0  ;;  %s125_s0 = inlined_call_operand.hbm [shape: f32[8,16], index: 0, kind: input, shape index: {}]   ;;  %s126_s1 = inlined_call_operand.hbm [shape: f32[8,13], index: 1, kind: output, shape index: {}]  }
   0x1   :  { %7 = vsyncpa [#allocation4], 0  ;;  %s89_s6 = smov [#allocation2]   ;;  %s41_s10 = scalar_lea.hbm %s125_s0, 128 }
   0x2   :  { %s14_s7 = sshll.u32 %s89_s6, 4  ;;  %p42_p0 = scmp.ne.s32.totalorder %s125_s0, %s41_s10  ;;  %s15_s7 = int_to_ptr.vmem [resolvable:$true] %s14_s7 }
   0x3   :  { %p45_p1 = scmp.lt.u32.totalorder %s41_s10, %s125_s0 }
   0x5   :  { %p47_p2 = pnand %p45_p1, %p42_p0 }
   0x7   :  { %50 = shalt.err (!%p47_p2)
}
   0x8   :  { %s51_s15 = scalar_lea.vmem %s15_s7, 128  ;;  %p56_p4 = scmp.lt.s32.totalorder %s15_s7, %s15_s7 }
   0x9   :  { %p52_p3 = scmp.ne.s32.totalorder %s15_s7, %s51_s15  ;;  %p57_p5 = scmp.lt.s32.totalorder %s51_s15, %s51_s15 }
   0xb   :  { %p58_p6 = por %p57_p5, %p56_p4 }
   0xd   :  { %p59_p7 = pnand %p58_p6, %p52_p3 }
   0xf   :  { %62 = shalt.err (!%p59_p7)
}
  0x10   :  { %17 = dma.hbm_to_vmem [thread:$0]  %s125_s0, 128, %s15_s7, [#allocation3]  }
  0x11   :  { %85 = dma.done.wait [#allocation3], 128  }
  0x12   :  { %86 = vsyncadd [#allocation3], 4294967168  ;;  %s90_s18 = smov [#allocation5]   ;;  %vm22_vm0 = vcmask 105472   ;;  %v21_v0 = vld [vmem:[#allocation2] sm:$0xff] }
  0x13   :  { %s30_s19 = sshll.u32 %s90_s18, 4  ;;  %23 = vst.msk [vmem:[#allocation5] sm:$0xff] %vm22_vm0, %v21_v0  ;;  %s31_s19 = int_to_ptr.vmem [resolvable:$true] %s30_s19 }
  0x14   :  { %s63_s20 = scalar_lea.vmem %s31_s19, 128  ;;  %p68_p9 = scmp.lt.s32.totalorder %s31_s19, %s31_s19 }
  0x15   :  { %p64_p8 = scmp.ne.s32.totalorder %s31_s19, %s63_s20  ;;  %p69_p10 = scmp.lt.s32.totalorder %s63_s20, %s63_s20 }
  0x17   :  { %p70_p11 = por %p69_p10, %p68_p9 }
  0x19   :  { %p71_p12 = pnand %p70_p11, %p64_p8 }
  0x1b   :  { %74 = shalt.err (!%p71_p12)
}
  0x1c   :  { %s75_s23 = scalar_lea.hbm %s126_s1, 128 }
  0x1d   :  { %p76_p13 = scmp.ne.s32.totalorder %s126_s1, %s75_s23  ;;  %p79_p0 = scmp.lt.u32.totalorder %s75_s23, %s126_s1 }
  0x1f   :  { %p81_p1 = pnand %p79_p0, %p76_p13 }
  0x21   :  { %84 = shalt.err (!%p81_p1)
}
  0x22   :  { %33 = dma.vmem_to_hbm [thread:$0]  %s31_s19, 128, %s126_s1, [#allocation4]  }
  0x23   :  { %87 = dma.done.wait [#allocation4], 128  }
  0x24   :  { %88 = vsyncadd [#allocation4], 4294967168 }
  0x25   :  { %37 = vsyncpa [#allocation3], 1 }
  0x26   :  { %38 = vsyncpa [#allocation4], 1 }

</bundles_post_ra>
